<compile_context>
chip_gen: v7x
topology: tpu7x:2x2x1
jax: 0.10.0
libtpu: 0.0.40
codegen_flags: <defaults>
</compile_context>

<pallas_src>
import functools

import jax
import jax.numpy as jnp
from jax.experimental import pallas as pl
from jax.experimental.pallas import tpu as pltpu


def _round_up(a, b):
    return ((a + b - 1) // b) * b


def _recip(s):
    # EUP approximate reciprocal + one Newton-Raphson refinement step.
    # Quadratic convergence: any >=8-bit hardware approximation lands well
    # below 1e-5 relative error; the heavy op stays off the VPU slot.
    r = pl.reciprocal(s, approx=True)
    return r * (2.0 - s * r)


def _norm_sum_packed_kernel(b_ref, x_ref, o_ref, *, val, use_split):
    """Lane-packed path: each 128-lane vector row holds 128//D independent D-segments.

    b_ref: (128, 128) bf16 block-diagonal ones matrix (segments of width D).
    x_ref/o_ref: (block_rows, 128) tiles of the packed array.
    """
    x = x_ref[...]
    xf = x.astype(jnp.float32)
    b = b_ref[...]                                        # exact 0/1 in bf16

    if use_split:
        # Two-term bf16 split of the f32 operand (hi + mid ~ 16 mantissa bits);
        # B is exact, so the MXU segmented sums are accurate to ~2^-16 relative.
        hi = xf.astype(jnp.bfloat16)
        mid = (xf - hi.astype(jnp.float32)).astype(jnp.bfloat16)
        s = jnp.dot(hi, b, preferred_element_type=jnp.float32)
        s = s + jnp.dot(mid, b, preferred_element_type=jnp.float32)
    else:
        # Input already bf16: one matmul gives the exact segmented sums.
        s = jnp.dot(x, b, preferred_element_type=jnp.float32)
    # s[t, l] == sum of the D-wide segment containing lane l (already broadcast).

    scale = _recip(s)
    if val != 1.0:                                        # specialized out for val == 1
        scale = scale * val
    o_ref[...] = (xf * scale).astype(o_ref.dtype)


def _norm_sum_rowsum_kernel(x_ref, o_ref, *, val):
    """General path (D >= 128 or D not a divisor of 128): plain row reduce."""
    x = x_ref[...].astype(jnp.float32)
    s = jnp.sum(x, axis=-1, keepdims=True)                # XLU reduce, compact (T, 1)
    scale = _recip(s)
    if val != 1.0:
        scale = scale * val
    o_ref[...] = (x * scale).astype(o_ref.dtype)


def norm_sum(x, val=1.0, *, target_block_bytes=4 * 1024 * 1024):
    """Pallas implementation of NormSum.forward for arbitrary-rank x."""
    orig_shape = x.shape
    d = int(orig_shape[-1])
    x2 = x.reshape(-1, d)
    rows = int(x2.shape[0])
    val = float(val)
    itemsize = jnp.dtype(x2.dtype).itemsize

    compiler_params = pltpu.CompilerParams(
        dimension_semantics=("parallel",),
        vmem_limit_bytes=48 * 1024 * 1024,   # safe on v7x (64 MiB), roomy on v5e/v6e
    )

    if d < 128 and 128 % d == 0:
        # ---------------- lane-packed path (e.g. D = 16) ----------------
        pack = 128 // d
        n_valid = rows

        # Tiny fallback pad (ones) only when rows isn't a multiple of the packing;
        # the common case is copy-free (the reshape below is layout-preserving).
        if rows % pack != 0:
            pad = jnp.ones((_round_up(rows, pack) - rows, d), dtype=x2.dtype)
            x2 = jnp.concatenate([x2, pad], axis=0)
        p_rows = x2.shape[0] // pack
        xp = x2.reshape(p_rows, pack * d)                  # (P, 128) lane-dense

        # ~target_block_bytes per input block, sublane-aligned; partial last block
        # is handled by the cdiv grid (OOB writes are dropped).
        block_rows = max(8, ((target_block_bytes // (128 * itemsize)) // 8) * 8)
        if block_rows >= p_rows:
            block_rows = p_rows                            # single full block
        grid = (pl.cdiv(p_rows, block_rows),)

        # Block-diagonal ones: B[i, j] = 1 iff lanes i, j are in the same D-segment.
        seg_id = jnp.arange(128, dtype=jnp.int32) // d
        b = (seg_id[:, None] == seg_id[None, :]).astype(jnp.bfloat16)

        use_split = x2.dtype != jnp.bfloat16

        out = pl.pallas_call(
            functools.partial(_norm_sum_packed_kernel, val=val, use_split=use_split),
            out_shape=jax.ShapeDtypeStruct(xp.shape, x2.dtype),
            grid_spec=pltpu.PrefetchScalarGridSpec(
                num_scalar_prefetch=0,
                grid=grid,
                in_specs=[
                    # Constant block index: Pallas issues this DMA once, not per step.
                    pl.BlockSpec((128, 128), lambda i: (0, 0)),
                    pl.BlockSpec((block_rows, 128), lambda i: (i, 0)),
                ],
                out_specs=pl.BlockSpec((block_rows, 128), lambda i: (i, 0)),
            ),
            compiler_params=compiler_params,
        )(b, xp)

        out = out.reshape(p_rows * pack, d)
        if p_rows * pack != n_valid:
            out = out[:n_valid]
        return out.reshape(orig_shape)

    # ---------------- general path: full-D blocks, cdiv-masked tail ----------------
    # TODO(synk): for D < 128 that does not divide 128 (48, 80, 96) a per-segment
    # lane pad would enable the packed MXU path; left lane-sparse here.
    block_rows = max(8, ((target_block_bytes // (d * itemsize)) // 8) * 8)
    if block_rows >= rows:
        block_rows = rows                                  # single full block
    grid = (pl.cdiv(rows, block_rows),)

    out = pl.pallas_call(
        functools.partial(_norm_sum_rowsum_kernel, val=val),
        out_shape=jax.ShapeDtypeStruct((rows, d), x2.dtype),
        grid_spec=pltpu.PrefetchScalarGridSpec(
            num_scalar_prefetch=0,
            grid=grid,
            in_specs=[pl.BlockSpec((block_rows, d), lambda i: (i, 0))],
            out_specs=pl.BlockSpec((block_rows, d), lambda i: (i, 0)),
        ),
        compiler_params=compiler_params,
    )(x2)
    return out.reshape(orig_shape)


def norm_sum_ref(x, val=1.0):
    return val * x / jnp.sum(x, axis=-1, keepdims=True)


if __name__ == "__main__":
    key = jax.random.PRNGKey(0)

    # Tolerances reflect the two-term bf16 split (~2^-16 relative on the row sum)
    # plus the Newton-refined approximate reciprocal; structural bugs are O(1).
    RTOL, ATOL = 5e-5, 5e-6

    # 1) Main shape consistent with the module's usage (last axis normalized).
    x = jax.random.uniform(key, (2, 4, 16, 16), dtype=jnp.float32) + 0.1
    y = jax.block_until_ready(norm_sum(x, val=1.0))
    y_ref = norm_sum_ref(x, val=1.0)
    assert y.shape == x.shape and y.dtype == x.dtype
    assert jnp.allclose(y, y_ref, atol=ATOL, rtol=RTOL)
    assert jnp.allclose(jnp.sum(y, axis=-1), 1.0, atol=1e-4, rtol=1e-4)

    # 2) Row count not a multiple of the packing (pad fallback) + val != 1.0.
    k1, k2, k3 = jax.random.split(key, 3)
    x2 = jax.random.uniform(k1, (3, 5, 7, 16), dtype=jnp.float32) + 0.1
    y2 = jax.block_until_ready(norm_sum(x2, val=2.5))
    assert jnp.allclose(y2, norm_sum_ref(x2, val=2.5), atol=ATOL, rtol=RTOL)
    assert jnp.allclose(jnp.sum(y2, axis=-1), 2.5, atol=2e-4, rtol=1e-4)

    # 3) General (non-packed) path: D neither a divisor nor a multiple of 128.
    x3 = jax.random.uniform(k2, (4, 6, 160), dtype=jnp.float32) + 0.1
    y3 = jax.block_until_ready(norm_sum(x3, val=1.0))
    assert jnp.allclose(y3, norm_sum_ref(x3, val=1.0), atol=ATOL, rtol=RTOL)
    assert jnp.allclose(jnp.sum(y3, axis=-1), 1.0, atol=1e-4, rtol=1e-4)

    # 4) bf16 input exercises the single-matmul (no-split) specialization.
    x4 = (jax.random.uniform(k3, (2, 4, 16, 16), dtype=jnp.float32) + 0.1
          ).astype(jnp.bfloat16)
    y4 = jax.block_until_ready(norm_sum(x4, val=1.0))
    y4_ref = norm_sum_ref(x4.astype(jnp.float32), val=1.0)
    assert y4.dtype == jnp.bfloat16
    assert jnp.allclose(y4.astype(jnp.float32), y4_ref, atol=1e-3, rtol=1e-2)
    assert jnp.allclose(jnp.sum(y4.astype(jnp.float32), axis=-1), 1.0, atol=5e-3)

    print("KERNEL_OK")
</pallas_src>

<mosaic_0001>
module attributes {stable_mosaic.version = 11 : i64} {
  func.func @_norm_sum_packed_kernel(%arg0: i32, %arg1: memref<128x128xbf16, #tpu.memory_space<vmem>>, %arg2: memref<16x128xf32, #tpu.memory_space<vmem>>, %arg3: memref<16x128xf32, #tpu.memory_space<vmem>>) attributes {dimension_semantics = [#tpu.dimension_semantics<parallel>], iteration_bounds = array<i64: 1>, scalar_prefetch = 0 : i64, scratch_operands = 0 : i64, tpu.core_type = #tpu.core_type<tc>, window_params = [{pipeline_mode = #tpu.pipeline_mode<synchronous>, transform_indices = @transform_0, window_bounds = array<i64: 128, 128>}, {transform_indices = @transform_1, window_bounds = array<i64: 16, 128>}, {transform_indices = @transform_2, window_bounds = array<i64: 16, 128>}]} {
    %c0 = arith.constant 0 : index
    %c0_0 = arith.constant 0 : index
    %0 = vector.load %arg2[%c0, %c0_0] : memref<16x128xf32, #tpu.memory_space<vmem>>, vector<16x128xf32>
    %c0_1 = arith.constant 0 : index
    %c0_2 = arith.constant 0 : index
    %1 = vector.load %arg1[%c0_1, %c0_2] : memref<128x128xbf16, #tpu.memory_space<vmem>>, vector<128x128xbf16>
    %2 = arith.truncf %0 : vector<16x128xf32> to vector<16x128xbf16>
    %3 = arith.extf %2 : vector<16x128xbf16> to vector<16x128xf32>
    %4 = arith.subf %0, %3 : vector<16x128xf32>
    %5 = arith.truncf %4 : vector<16x128xf32> to vector<16x128xbf16>
    %cst = arith.constant dense<0.000000e+00> : vector<16x128xf32>
    %6 = tpu.matmul %2, %1, %cst {dimension_numbers = #tpu.dot_dimension_numbers<[1], [0], [0], [1], [0, 0, 1, 1], [], []>} : vector<16x128xbf16>, vector<128x128xbf16>, vector<16x128xf32> -> vector<16x128xf32>
    %cst_3 = arith.constant dense<0.000000e+00> : vector<16x128xf32>
    %7 = tpu.matmul %5, %1, %cst_3 {dimension_numbers = #tpu.dot_dimension_numbers<[1], [0], [0], [1], [0, 0, 1, 1], [], []>} : vector<16x128xbf16>, vector<128x128xbf16>, vector<16x128xf32> -> vector<16x128xf32>
    %8 = arith.addf %6, %7 : vector<16x128xf32>
    %9 = tpu.reciprocal %8 {approx = true} : vector<16x128xf32> -> vector<16x128xf32>
    %10 = arith.mulf %8, %9 : vector<16x128xf32>
    %cst_4 = arith.constant 2.000000e+00 : f32
    %11 = vector.broadcast %cst_4 : f32 to vector<16x128xf32>
    %12 = arith.subf %11, %10 : vector<16x128xf32>
    %13 = arith.mulf %9, %12 : vector<16x128xf32>
    %14 = arith.mulf %0, %13 : vector<16x128xf32>
    %c0_5 = arith.constant 0 : index
    %c0_6 = arith.constant 0 : index
    %15 = vector.load %arg3[%c0_5, %c0_6] : memref<16x128xf32, #tpu.memory_space<vmem>>, vector<16x128xf32>
    tpu.vector_store %arg3[%c0_5, %c0_6], %14 {strides = array<i32>} : memref<16x128xf32, #tpu.memory_space<vmem>>, vector<16x128xf32>,
    return
  }
  func.func @transform_0(%arg0: i32) -> (i32, i32) {
    %c0_i32 = arith.constant 0 : i32
    %c0_i32_0 = arith.constant 0 : i32
    %c0_i32_1 = arith.constant 0 : i32
    return %c0_i32, %c0_i32_0 : i32, i32
  }
  func.func @transform_1(%arg0: i32) -> (i32, i32) {
    %c0_i32 = arith.constant 0 : i32
    %c0_i32_0 = arith.constant 0 : i32
    return %arg0, %c0_i32 : i32, i32
  }
  func.func @transform_2(%arg0: i32) -> (i32, i32) {
    %c0_i32 = arith.constant 0 : i32
    %c0_i32_0 = arith.constant 0 : i32
    return %arg0, %c0_i32 : i32, i32
  }
}

</mosaic_0001>

<bundles_post_ra>
// kernel: tpu_custom_call.1
= control target key start
LH: loop header
LB: loop body
LE: loop exit
PB: predicated region body
PF: predicated region fallthrough
CT: control target
= control target key end

     0   :  { %7 = vsyncpa [#allocation3], 0  ;;  %s452_s0 = inlined_call_operand.hbm [shape: bf16[128,128], index: 0, kind: input, shape index: {}]   ;;  %s453_s1 = inlined_call_operand.hbm [shape: f32[16,128], index: 1, kind: input, shape index: {}]   ;;  %s454_s2 = inlined_call_operand.hbm [shape: f32[16,128], index: 2, kind: output, shape index: {}]  }
   0x1   :  { %8 = vsyncpa [#allocation6], 0 }
   0x2   :  { %9 = vsyncpa [#allocation4], 0  ;;  %s386_s9 = smov [#allocation2]   ;;  %s314_s13 = scalar_lea.hbm %s452_s0, 1024 }
   0x3   :  { %s15_s10 = sshll.u32 %s386_s9, 4  ;;  %p315_p0 = scmp.ne.s32.totalorder %s452_s0, %s314_s13  ;;  %s16_s10 = int_to_ptr.vmem [resolvable:$true] %s15_s10 }
   0x4   :  { %p318_p1 = scmp.lt.u32.totalorder %s314_s13, %s452_s0 }
   0x6   :  { %p320_p2 = pnand %p318_p1, %p315_p0 }
   0x8   :  { %323 = shalt.err (!%p320_p2)
}
   0x9   :  { %s324_s18 = scalar_lea.vmem %s16_s10, 1024  ;;  %p329_p4 = scmp.lt.s32.totalorder %s16_s10, %s16_s10 }
   0xa   :  { %p325_p3 = scmp.ne.s32.totalorder %s16_s10, %s324_s18  ;;  %p330_p5 = scmp.lt.s32.totalorder %s324_s18, %s324_s18 }
   0xc   :  { %p331_p6 = por %p330_p5, %p329_p4 }
   0xe   :  { %p332_p7 = pnand %p331_p6, %p325_p3 }
  0x10   :  { %335 = shalt.err (!%p332_p7)
}
  0x11   :  { %s387_s19 = smov 64   ;;  %s388_s20 = smov 4  }
  0x12   :  { %21 = dma.hbm_to_vmem [thread:$0]  %s452_s0, 1024, %s16_s10, [#allocation3], %s387_s19, %s387_s19, %s388_s20  }
  0x13   :  { %s389_s23 = smov [#allocation5]   ;;  %s336_s27 = scalar_lea.hbm %s453_s1, 256 }
  0x14   :  { %s27_s24 = sshll.u32 %s389_s23, 4  ;;  %p337_p8 = scmp.ne.s32.totalorder %s453_s1, %s336_s27  ;;  %s28_s24 = int_to_ptr.vmem [resolvable:$true] %s27_s24 }
  0x15   :  { %p340_p9 = scmp.lt.u32.totalorder %s336_s27, %s453_s1 }
  0x17   :  { %p342_p10 = pnand %p340_p9, %p337_p8 }
  0x19   :  { %345 = shalt.err (!%p342_p10)
}
  0x1a   :  { %s346_s4 = scalar_lea.vmem %s28_s24, 256  ;;  %p351_p12 = scmp.lt.s32.totalorder %s28_s24, %s28_s24 }
  0x1b   :  { %p347_p11 = scmp.ne.s32.totalorder %s28_s24, %s346_s4  ;;  %p352_p13 = scmp.lt.s32.totalorder %s346_s4, %s346_s4 }
  0x1d   :  { %p353_p0 = por %p352_p13, %p351_p12 }
  0x1f   :  { %p354_p1 = pnand %p353_p0, %p347_p11 }
  0x21   :  { %357 = shalt.err (!%p354_p1)
}
  0x22   :  { %s390_s0 = smov 128   ;;  %s391_s5 = smov 8  }
  0x23   :  { %33 = dma.hbm_to_vmem [thread:$0]  %s453_s1, 256, %s28_s24, [#allocation6], %s390_s0, %s390_s0, %s391_s5  }
  0x24   :  { %380 = dma.done.wait [#allocation3], 1024  }
  0x25   :  { %381 = vsyncadd [#allocation3], 4294966272 }
  0x26   :  { %382 = dma.done.wait [#allocation6], 256  }
  0x27   :  { %383 = vsyncadd [#allocation6], 4294967040  ;;  %v392_v0 = vmov 0.0   ;;  %vm393_vm0 = vmmov 0   ;;  %v302_v1 = vld [vmem:[#allocation2] sm:$0xff]   ;;  %v303_v2 = vld [vmem:[#allocation2 + $0x8] sm:$0xff]  }
  0x28   :  { %251 = vmatprep.subr.bf16.mxu1 %v392_v0  ;;  %271 = vmatprep.subr.bf16.mxu0 %v392_v0  ;;  %v304_v3 = vld [vmem:[#allocation2 + $0x10] sm:$0xff]   ;;  %v305_v4 = vld [vmem:[#allocation2 + $0x18] sm:$0xff]   ;;  %v306_v5 = vld [vmem:[#allocation2 + $0x20] sm:$0xff]   ;;  %s394_s1 = smov [#allocation7]  }
  0x29   :  { %267 = vmatprep.mubr.msk.bf16.mxu1 %vm393_vm0, %v392_v0  ;;  %287 = vmatprep.mubr.msk.bf16.mxu0 %vm393_vm0, %v392_v0  ;;  %v41_v6 = vld [vmem:[#allocation5] sm:$0xff]  ;;  %v42_v7 = vld [vmem:[#allocation5 + $0x8] sm:$0xff]  ;;  %v308_v12 = vld [vmem:[#allocation2 + $0x30] sm:$0xff]   ;;  %s212_s8 = sshll.u32 %s394_s1, 4  ;;  %s213_s8 = int_to_ptr.vmem [resolvable:$true] %s212_s8 }
  0x2a   :  { %252 = vmatpush3.bf16.msra.mxu1 %v302_v1  ;;  %272 = vmatpush3.bf16.msra.mxu0 %v302_v1  ;;  %v59_v8 = vpack.c.bf16 %v42_v7, %v41_v6  ;;  %v307_v9 = vld [vmem:[#allocation2 + $0x28] sm:$0xff]   ;;  %v309_v15 = vld [vmem:[#allocation2 + $0x38] sm:$0xff]   ;;  %s358_s9 = scalar_lea.vmem %s213_s8, 256  ;;  %p363_p3 = scmp.lt.s32.totalorder %s213_s8, %s213_s8 }
  0x2b   :  { %253 = vmatprep.subr.bf16.mxu1 %v392_v0  ;;  %273 = vmatprep.subr.bf16.mxu0 %v392_v0  ;;  %p359_p2 = scmp.ne.s32.totalorder %s213_s8, %s358_s9  ;;  %p364_p4 = scmp.lt.s32.totalorder %s358_s9, %s358_s9 }
  0x2c   :  { %v60_v10 = vunpack.c.l.bf16 %v59_v8  ;;  %v61_v11 = vunpack.c.h.bf16 %v59_v8 }
  0x2d   :  { %p365_p5 = por %p364_p4, %p363_p3 }
  0x2e   :  { %254 = vmatpush3.bf16.msra.mxu1 %v303_v2  ;;  %274 = vmatpush3.bf16.msra.mxu0 %v303_v2  ;;  %v62_v13 = vsub.f32 %v41_v6, %v60_v10  ;;  %v63_v14 = vsub.f32 %v42_v7, %v61_v11 }
  0x2f   :  { %255 = vmatprep.subr.bf16.mxu1 %v392_v0  ;;  %275 = vmatprep.subr.bf16.mxu0 %v392_v0  ;;  %p366_p6 = pnand %p365_p5, %p359_p2 }
  0x30   :  { %v64_v16 = vpack.c.bf16 %v63_v14, %v62_v13 }
  0x32   :  { %256 = vmatpush3.bf16.msra.mxu1 %v304_v3  ;;  %276 = vmatpush3.bf16.msra.mxu0 %v304_v3 }
  0x33   :  { %257 = vmatprep.subr.bf16.mxu1 %v392_v0  ;;  %277 = vmatprep.subr.bf16.mxu0 %v392_v0 }
  0x36   :  { %258 = vmatpush3.bf16.msra.mxu1 %v305_v4  ;;  %278 = vmatpush3.bf16.msra.mxu0 %v305_v4 }
  0x37   :  { %259 = vmatprep.subr.bf16.mxu1 %v392_v0  ;;  %279 = vmatprep.subr.bf16.mxu0 %v392_v0 }
  0x3a   :  { %260 = vmatpush3.bf16.msra.mxu1 %v306_v5  ;;  %280 = vmatpush3.bf16.msra.mxu0 %v306_v5 }
  0x3b   :  { %261 = vmatprep.subr.bf16.mxu1 %v392_v0  ;;  %281 = vmatprep.subr.bf16.mxu0 %v392_v0 }
  0x3e   :  { %262 = vmatpush3.bf16.msra.mxu1 %v307_v9  ;;  %282 = vmatpush3.bf16.msra.mxu0 %v307_v9 }
  0x3f   :  { %263 = vmatprep.subr.bf16.mxu1 %v392_v0  ;;  %283 = vmatprep.subr.bf16.mxu0 %v392_v0 }
  0x42   :  { %264 = vmatpush3.bf16.msra.mxu1 %v308_v12  ;;  %284 = vmatpush3.bf16.msra.mxu0 %v308_v12 }
  0x43   :  { %265 = vmatprep.subr.bf16.mxu1 %v392_v0  ;;  %285 = vmatprep.subr.bf16.mxu0 %v392_v0 }
  0x46   :  { %266 = vmatpush3.bf16.msra.mxu1 %v309_v15  ;;  %286 = vmatpush3.bf16.msra.mxu0 %v309_v15 }
  0x49   :  { %268 = vmatmul.mubr.bf16.vlgmr.msra.gmra.mrb[0].mxu1 %v64_v16  ;;  %288 = vmatmul.mubr.bf16.vlgmr.msra.gmra.mrb[0].mxu0 %v59_v8 }
 0x11c   :  { %v147_v17 = vpop.f32.mrb[0].mxu1  ;;  %v188_v18 = vpop.f32.mrb[0].mxu0 }
 0x11d   :  { %v189_v19 = vadd.f32 %v188_v18, %v147_v17  ;;  %v269_v20 = vpop.f32.mrb[1].mxu1  ;;  %v289_v21 = vpop.f32.mrb[1].mxu0 }
 0x11e   :  { %v150_v22 = vpop.f32.mrb[2].mxu1  ;;  %v191_v23 = vpop.f32.mrb[2].mxu0 }
 0x11f   :  { %310 = vrcp.f32 %v189_v19  ;;  %v192_v24 = vadd.f32 %v191_v23, %v150_v22  ;;  %v270_v25 = vpop.f32.mrb[3].mxu1  ;;  %v290_v26 = vpop.f32.mrb[3].mxu0 }
 0x121   :  { %312 = vrcp.f32 %v192_v24 }
 0x129   :  { %v311_v27 = vpop.eup %310 }
 0x12a   :  { %v197_v28 = vmul.f32 %v311_v27, %v189_v19 }
 0x12b   :  { %v313_v29 = vpop.eup %312 }
 0x12c   :  { %v199_v30 = vsub.f32 2.0, %v197_v28  ;;  %v198_v31 = vmul.f32 %v313_v29, %v192_v24 }
 0x12e   :  { %v201_v32 = vmul.f32 %v311_v27, %v199_v30  ;;  %v200_v33 = vsub.f32 2.0, %v198_v31 }
 0x130   :  { %v202_v34 = vmul.f32 %v313_v29, %v200_v33  ;;  %v203_v35 = vmul.f32 %v201_v32, %v41_v6 }
 0x132   :  { %v204_v36 = vmul.f32 %v202_v34, %v42_v7  ;;  %205 = vst [vmem:[#allocation7] sm:$0xff] %v203_v35 }
 0x134   :  { %206 = vst [vmem:[#allocation7 + $0x8] sm:$0xff] %v204_v36 }
 0x135   :  { %369 = shalt.err (!%p366_p6)
}
 0x136   :  { %s370_s12 = scalar_lea.hbm %s454_s2, 256 }
 0x137   :  { %p371_p7 = scmp.ne.s32.totalorder %s454_s2, %s370_s12  ;;  %p374_p8 = scmp.lt.u32.totalorder %s370_s12, %s454_s2 }
 0x139   :  { %p376_p9 = pnand %p374_p8, %p371_p7 }
 0x13b   :  { %379 = shalt.err (!%p376_p9)
}
 0x13c   :  { %218 = dma.vmem_to_hbm [thread:$0]  %s213_s8, 256, %s454_s2, [#allocation4], %s390_s0, %s390_s0, %s391_s5  }
 0x13d   :  { %384 = dma.done.wait [#allocation4], 256  }
 0x13e   :  { %385 = vsyncadd [#allocation4], 4294967040 }
 0x13f   :  { %222 = vsyncpa [#allocation3], 1 }
 0x140   :  { %223 = vsyncpa [#allocation6], 1 }
 0x141   :  { %224 = vsyncpa [#allocation4], 1 }

</bundles_post_ra>
